<compile_context>
chip_gen: v7x
topology: tpu7x:2x2x1
jax: 0.10.0
libtpu: 0.0.40
codegen_flags: <defaults>
</compile_context>

<pallas_src>
import functools

import jax
import jax.numpy as jnp
from jax.experimental import pallas as pl
from jax.experimental.pallas import tpu as pltpu


def _scale_shift_kernel(x_ref, o_ref, *, scale, shift):
    x = x_ref[...]
    # scale / shift are static Python constants (resolved at trace time,
    # mirroring the PyTorch module's constructor-time branches).
    if scale != 1:
        x = x * jnp.asarray(scale, dtype=x.dtype)
    if shift != 0:
        x = x + jnp.asarray(shift, dtype=x.dtype)
    o_ref[...] = x


_LANE_CANDIDATES = (1024, 512, 256, 128)
_TARGET_BLOCK_BYTES = 2 * 1024 * 1024  # ~2 MiB/block; 4x (double-buffered
                                       # in+out) = 8 MiB -> fits all gens.


def _choose_tiling(total, itemsize):
    """Pick (lane, rows, tile_rows) for a lane-dense 2D view of `total` elems."""
    lane = None
    # Prefer a lane width that still leaves >= 8 rows (fills sublanes);
    # otherwise take the widest divisor.
    for cand in _LANE_CANDIDATES:
        if total % cand == 0 and (total // cand) >= 8:
            lane = cand
            break
    if lane is None:
        for cand in _LANE_CANDIDATES:
            if total % cand == 0:
                lane = cand
                break
    if lane is None:
        return None
    rows = total // lane
    target_rows = max(8, _TARGET_BLOCK_BYTES // (lane * itemsize))
    if rows <= target_rows:
        # Small/medium input: one block, or two when cleanly divisible so a
        # v7x megacore has work for both TensorCores.
        if rows >= 16 and rows % 16 == 0:
            tile_rows = rows // 2
        else:
            tile_rows = rows
    else:
        tile_rows = (target_rows // 8) * 8  # keep (8, 128) block constraint
    return lane, rows, tile_rows


def scale_shift(x, scale=1.0, shift=0.0):
    """Apply y = x * scale + shift elementwise via a Pallas TPU kernel."""
    # Identity branch: PyTorch returns x unchanged; skip the kernel entirely.
    if scale == 1 and shift == 0:
        return x

    orig_shape = x.shape

    # Match PyTorch promotion: int tensor * non-integer python float -> float.
    if not jnp.issubdtype(x.dtype, jnp.inexact) and (
            float(scale) != int(scale) or float(shift) != int(shift)):
        x = x.astype(jnp.float32)

    total = x.size
    itemsize = jnp.dtype(x.dtype).itemsize

    flat = x.reshape(-1)
    tiling = _choose_tiling(total, itemsize)
    padded = 0
    if tiling is None:
        # Rare corner case: element count not a multiple of 128.  Pad the
        # flat view up to the next lane multiple (< 128 extra elements).
        padded = (-total) % 128
        flat = jnp.pad(flat, (0, padded))
        tiling = _choose_tiling(total + padded, itemsize)
    lane, rows, tile_rows = tiling

    x2d = flat.reshape(rows, lane)
    grid = (pl.cdiv(rows, tile_rows),)

    kernel = functools.partial(_scale_shift_kernel, scale=scale, shift=shift)

    out = pl.pallas_call(
        kernel,
        out_shape=jax.ShapeDtypeStruct((rows, lane), x.dtype),
        grid_spec=pltpu.PrefetchScalarGridSpec(
            num_scalar_prefetch=0,
            grid=grid,
            in_specs=[pl.BlockSpec((tile_rows, lane), lambda i: (i, 0))],
            out_specs=pl.BlockSpec((tile_rows, lane), lambda i: (i, 0)),
        ),
        compiler_params=pltpu.CompilerParams(
            dimension_semantics=("parallel",)),
    )(x2d)

    out = out.reshape(-1)
    if padded:
        out = out[:total]
    return out.reshape(orig_shape)


if __name__ == "__main__":
    key = jax.random.PRNGKey(0)
    # NCHW input, small shape consistent with the module's usage.
    x = jax.random.normal(key, (2, 4, 16, 16), dtype=jnp.float32)

    scale = 2.5
    shift = -0.75

    # Full scale+shift path.
    y = jax.block_until_ready(scale_shift(x, scale=scale, shift=shift))
    y_ref = x * scale + shift
    assert y.shape == x.shape and y.dtype == x.dtype
    assert jnp.allclose(y, y_ref, atol=1e-6, rtol=1e-6), "mismatch vs reference"

    # Scale-only branch.
    y_s = jax.block_until_ready(scale_shift(x, scale=3.0, shift=0))
    assert jnp.allclose(y_s, x * 3.0, atol=1e-6, rtol=1e-6), "scale-only mismatch"

    # Shift-only branch.
    y_t = jax.block_until_ready(scale_shift(x, scale=1, shift=0.5))
    assert jnp.allclose(y_t, x + 0.5, atol=1e-6, rtol=1e-6), "shift-only mismatch"

    # Identity branch (scale=1, shift=0) -> returns x, no kernel launch.
    y_id = jax.block_until_ready(scale_shift(x, scale=1, shift=0))
    assert jnp.array_equal(y_id, x), "identity branch mismatch"

    print("KERNEL_OK")
</pallas_src>

<mosaic_0001>
module attributes {stable_mosaic.version = 11 : i64} {
  func.func @_scale_shift_kernel(%arg0: i32, %arg1: memref<8x256xf32, #tpu.memory_space<vmem>>, %arg2: memref<8x256xf32, #tpu.memory_space<vmem>>) attributes {dimension_semantics = [#tpu.dimension_semantics<parallel>], iteration_bounds = array<i64: 1>, scalar_prefetch = 0 : i64, scratch_operands = 0 : i64, tpu.core_type = #tpu.core_type<tc>, window_params = [{transform_indices = @transform_0, window_bounds = array<i64: 8, 256>}, {transform_indices = @transform_1, window_bounds = array<i64: 8, 256>}]} {
    %c0 = arith.constant 0 : index
    %c0_0 = arith.constant 0 : index
    %0 = vector.load %arg1[%c0, %c0_0] : memref<8x256xf32, #tpu.memory_space<vmem>>, vector<8x256xf32>
    %cst = arith.constant 2.500000e+00 : f32
    %1 = vector.broadcast %cst : f32 to vector<8x256xf32>
    %2 = arith.mulf %0, %1 : vector<8x256xf32>
    %cst_1 = arith.constant -7.500000e-01 : f32
    %3 = vector.broadcast %cst_1 : f32 to vector<8x256xf32>
    %4 = arith.addf %2, %3 : vector<8x256xf32>
    %c0_2 = arith.constant 0 : index
    %c0_3 = arith.constant 0 : index
    %5 = vector.load %arg2[%c0_2, %c0_3] : memref<8x256xf32, #tpu.memory_space<vmem>>, vector<8x256xf32>
    tpu.vector_store %arg2[%c0_2, %c0_3], %4 {strides = array<i32>} : memref<8x256xf32, #tpu.memory_space<vmem>>, vector<8x256xf32>,
    return
  }
  func.func @transform_0(%arg0: i32) -> (i32, i32) {
    %c0_i32 = arith.constant 0 : i32
    %c0_i32_0 = arith.constant 0 : i32
    return %arg0, %c0_i32 : i32, i32
  }
  func.func @transform_1(%arg0: i32) -> (i32, i32) {
    %c0_i32 = arith.constant 0 : i32
    %c0_i32_0 = arith.constant 0 : i32
    return %arg0, %c0_i32 : i32, i32
  }
}

</mosaic_0001>

<bundles_post_ra>
// kernel: tpu_custom_call.1
= control target key start
LH: loop header
LB: loop body
LE: loop exit
PB: predicated region body
PF: predicated region fallthrough
CT: control target
= control target key end

     0   :  { %6 = vsyncpa [#allocation3], 0  ;;  %s130_s0 = inlined_call_operand.hbm [shape: f32[8,256], index: 0, kind: input, shape index: {}]   ;;  %s131_s1 = inlined_call_operand.hbm [shape: f32[8,256], index: 1, kind: output, shape index: {}]  }
   0x1   :  { %7 = vsyncpa [#allocation4], 0  ;;  %s94_s6 = smov [#allocation2]   ;;  %s46_s10 = scalar_lea.hbm %s130_s0, 256 }
   0x2   :  { %s14_s7 = sshll.u32 %s94_s6, 4  ;;  %p47_p0 = scmp.ne.s32.totalorder %s130_s0, %s46_s10  ;;  %s15_s7 = int_to_ptr.vmem [resolvable:$true] %s14_s7 }
   0x3   :  { %p50_p1 = scmp.lt.u32.totalorder %s46_s10, %s130_s0 }
   0x5   :  { %p52_p2 = pnand %p50_p1, %p47_p0 }
   0x7   :  { %55 = shalt.err (!%p52_p2)
}
   0x8   :  { %s56_s15 = scalar_lea.vmem %s15_s7, 256  ;;  %p61_p4 = scmp.lt.s32.totalorder %s15_s7, %s15_s7 }
   0x9   :  { %p57_p3 = scmp.ne.s32.totalorder %s15_s7, %s56_s15  ;;  %p62_p5 = scmp.lt.s32.totalorder %s56_s15, %s56_s15 }
   0xb   :  { %p63_p6 = por %p62_p5, %p61_p4 }
   0xd   :  { %p64_p7 = pnand %p63_p6, %p57_p3 }
   0xf   :  { %67 = shalt.err (!%p64_p7)
}
  0x10   :  { %17 = dma.hbm_to_vmem [thread:$0]  %s130_s0, 256, %s15_s7, [#allocation3]  }
  0x11   :  { %90 = dma.done.wait [#allocation3], 256  }
  0x12   :  { %91 = vsyncadd [#allocation3], 4294967040  ;;  %v21_v0 = vld [vmem:[#allocation2] sm:$0xff]  ;;  %v22_v1 = vld [vmem:[#allocation2 + $0x8] sm:$0xff]  ;;  %s95_s18 = smov [#allocation5]  }
  0x13   :  { %s35_s19 = sshll.u32 %s95_s18, 4  ;;  %v23_v2 = vmul.f32 2.5, %v21_v0  ;;  %v24_v3 = vmul.f32 2.5, %v22_v1  ;;  %s36_s19 = int_to_ptr.vmem [resolvable:$true] %s35_s19 }
  0x14   :  { %s68_s20 = scalar_lea.vmem %s36_s19, 256  ;;  %p73_p9 = scmp.lt.s32.totalorder %s36_s19, %s36_s19 }
  0x15   :  { %v25_v4 = vadd.f32 -0.75, %v23_v2  ;;  %v26_v5 = vadd.f32 -0.75, %v24_v3  ;;  %p69_p8 = scmp.ne.s32.totalorder %s36_s19, %s68_s20  ;;  %p74_p10 = scmp.lt.s32.totalorder %s68_s20, %s68_s20 }
  0x17   :  { %27 = vst [vmem:[#allocation5] sm:$0xff] %v25_v4  ;;  %28 = vst [vmem:[#allocation5 + $0x8] sm:$0xff] %v26_v5  ;;  %p75_p11 = por %p74_p10, %p73_p9 }
  0x19   :  { %p76_p12 = pnand %p75_p11, %p69_p8 }
  0x1b   :  { %79 = shalt.err (!%p76_p12)
}
  0x1c   :  { %s80_s22 = scalar_lea.hbm %s131_s1, 256 }
  0x1d   :  { %p81_p13 = scmp.ne.s32.totalorder %s131_s1, %s80_s22  ;;  %p84_p0 = scmp.lt.u32.totalorder %s80_s22, %s131_s1 }
  0x1f   :  { %p86_p1 = pnand %p84_p0, %p81_p13 }
  0x21   :  { %89 = shalt.err (!%p86_p1)
}
  0x22   :  { %38 = dma.vmem_to_hbm [thread:$0]  %s36_s19, 256, %s131_s1, [#allocation4]  }
  0x23   :  { %92 = dma.done.wait [#allocation4], 256  }
  0x24   :  { %93 = vsyncadd [#allocation4], 4294967040 }
  0x25   :  { %42 = vsyncpa [#allocation3], 1 }
  0x26   :  { %43 = vsyncpa [#allocation4], 1 }

</bundles_post_ra>
